<compile_context>
chip_gen: v7x
topology: tpu7x:2x2x1
jax: 0.10.0
libtpu: 0.0.40
codegen_flags: <defaults>
</compile_context>

<pallas_src>
import jax
import jax.numpy as jnp
from jax.experimental import pallas as pl
from jax.experimental.pallas import tpu as pltpu

_LANES = 128          # vreg lane width; output last dim must be lane-dense
_MAX_TILE_ROWS = 512  # 512 x 128 x 4B = 256 KiB per block (fits v7x VMEM easily)


def _single_variance_kernel(scale_ref, out_ref):
    # scale_ref: SMEM scalar (shape (1,)) holding exp(variance * 10.0).
    # out_ref:   VMEM (tile_rows, 128) output tile.
    # Pure broadcast store: one unmasked vst per vreg, no loads, no VALU work.
    out_ref[...] = jnp.full(out_ref.shape, scale_ref[0], dtype=out_ref.dtype)


def single_variance_forward(x, variance):
    """Forward of SingleVarianceNetwork.

    x:        any array whose leading dim is the batch (only len(x) is used).
    variance: scalar learned parameter.
    Returns [N, 1] float32 = exp(variance * 10).
    """
    n = x.shape[0]

    # Grid-invariant scalar, computed once (not per grid step).
    scale = jnp.exp(jnp.asarray(variance, dtype=jnp.float32) * 10.0).reshape((1,))

    # Lane-dense slab layout: rows of 128 f32 lanes, rows padded to a multiple
    # of the sublane count (8) and of the per-step tile.
    rows_needed = max(1, pl.cdiv(n, _LANES))
    tile_rows = min(_MAX_TILE_ROWS, ((rows_needed + 7) // 8) * 8)
    num_tiles = pl.cdiv(rows_needed, tile_rows)
    slab_rows = num_tiles * tile_rows

    slab = pl.pallas_call(
        _single_variance_kernel,
        out_shape=jax.ShapeDtypeStruct((slab_rows, _LANES), jnp.float32),
        grid=(num_tiles,),
        in_specs=[pl.BlockSpec(memory_space=pltpu.MemorySpace.SMEM)],
        out_specs=pl.BlockSpec((tile_rows, _LANES), lambda i: (i, 0)),
        compiler_params=pltpu.CompilerParams(
            dimension_semantics=("parallel",),
        ),
    )(scale)

    # Free layout plumbing back to the module's [N, 1] shape.
    return slab.reshape(-1)[:n].reshape(n, 1)


if __name__ == "__main__":
    key = jax.random.PRNGKey(0)

    # Deterministic parameter init, mirroring __init__(init_val=0.3).
    init_val = 0.3
    variance = jnp.float32(init_val)

    # Small example input consistent with the forward (only len(x) is used).
    x = jax.random.normal(key, (2, 4, 16, 16), dtype=jnp.float32)  # [B, C, H, W]

    out = single_variance_forward(x, variance)
    out = jax.block_until_ready(out)

    # Reference check in plain JAX.
    ref = jnp.ones((x.shape[0], 1), jnp.float32) * jnp.exp(variance * 10.0)
    assert out.shape == (2, 1), out.shape
    assert jnp.allclose(out, ref, rtol=1e-6, atol=1e-6), (out, ref)

    print("KERNEL_OK")
</pallas_src>

<mosaic_0001>
module attributes {stable_mosaic.version = 11 : i64} {
  func.func @_single_variance_kernel(%arg0: i32, %arg1: memref<1xf32, #tpu.memory_space<smem>>, %arg2: memref<8x128xf32, #tpu.memory_space<vmem>>) attributes {dimension_semantics = [#tpu.dimension_semantics<parallel>], iteration_bounds = array<i64: 1>, scalar_prefetch = 0 : i64, scratch_operands = 0 : i64, tpu.core_type = #tpu.core_type<tc>, window_params = [{transform_indices = @transform_0, window_bounds = array<i64: 1>}, {transform_indices = @transform_1, window_bounds = array<i64: 8, 128>}]} {
    %c0 = arith.constant 0 : index
    %0 = memref.load %arg1[%c0] : memref<1xf32, #tpu.memory_space<smem>>
    %1 = vector.broadcast %0 : f32 to vector<8x128xf32>
    %c0_0 = arith.constant 0 : index
    %c0_1 = arith.constant 0 : index
    %2 = vector.load %arg2[%c0_0, %c0_1] : memref<8x128xf32, #tpu.memory_space<vmem>>, vector<8x128xf32>
    tpu.vector_store %arg2[%c0_0, %c0_1], %1 {strides = array<i32>} : memref<8x128xf32, #tpu.memory_space<vmem>>, vector<8x128xf32>,
    return
  }
  func.func @transform_0(%arg0: i32) -> i32 {
    %c0_i32 = arith.constant 0 : i32
    %c0_i32_0 = arith.constant 0 : i32
    return %c0_i32 : i32
  }
  func.func @transform_1(%arg0: i32) -> (i32, i32) {
    %c0_i32 = arith.constant 0 : i32
    %c0_i32_0 = arith.constant 0 : i32
    return %arg0, %c0_i32 : i32, i32
  }
}

</mosaic_0001>

<bundles_post_ra>
// kernel: tpu_custom_call.1
= control target key start
LH: loop header
LB: loop body
LE: loop exit
PB: predicated region body
PF: predicated region fallthrough
CT: control target
= control target key end

     0   :  { %s78_s0 = inlined_call_operand.<no memory space> [shape: f32[1], index: 0, kind: input, shape index: {}]   ;;  %s79_s1 = inlined_call_operand.hbm [shape: f32[8,128], index: 1, kind: output, shape index: {}]  }
   0x1   :  { %v11_v0 = vstv %s78_s0 }
   0x2   :  { %7 = vsyncpa [#allocation4], 0  ;;  %12 = vst [vmem:[#allocation3] sm:$0xff] %v11_v0  ;;  %s52_s8 = smov [#allocation3]  }
   0x3   :  { %s19_s9 = sshll.u32 %s52_s8, 4  ;;  %s20_s9 = int_to_ptr.vmem [resolvable:$true] %s19_s9 }
   0x4   :  { %s28_s10 = scalar_lea.vmem %s20_s9, 128  ;;  %p33_p1 = scmp.lt.s32.totalorder %s20_s9, %s20_s9 }
   0x5   :  { %p29_p0 = scmp.ne.s32.totalorder %s20_s9, %s28_s10  ;;  %p34_p2 = scmp.lt.s32.totalorder %s28_s10, %s28_s10 }
   0x7   :  { %p35_p3 = por %p34_p2, %p33_p1 }
   0x9   :  { %p36_p4 = pnand %p35_p3, %p29_p0 }
   0xb   :  { %39 = shalt.err (!%p36_p4)
}
   0xc   :  { %s40_s13 = scalar_lea.hbm %s79_s1, 128 }
   0xd   :  { %p41_p5 = scmp.ne.s32.totalorder %s79_s1, %s40_s13  ;;  %p44_p6 = scmp.lt.u32.totalorder %s40_s13, %s79_s1 }
   0xf   :  { %p46_p7 = pnand %p44_p6, %p41_p5 }
  0x11   :  { %49 = shalt.err (!%p46_p7)
}
  0x12   :  { %22 = dma.vmem_to_hbm [thread:$0]  %s20_s9, 128, %s79_s1, [#allocation4]  }
  0x13   :  { %50 = dma.done.wait [#allocation4], 128  }
  0x14   :  { %51 = vsyncadd [#allocation4], 4294967168 }
  0x15   :  { %26 = vsyncpa [#allocation4], 1 }

</bundles_post_ra>
